<compile_context>
chip_gen: v7x
topology: tpu7x:2x2x1
jax: 0.10.0
libtpu: 0.0.40
codegen_flags: <defaults>
</compile_context>

<pallas_src>
import functools

import jax
import jax.numpy as jnp
from jax.experimental import pallas as pl
from jax.experimental.pallas import tpu as pltpu


_MAX_LANE = 1024                 # max lane-dense last dim (multiple of 128)
_TARGET_TILE_ELEMS = 512 * 1024  # ~2 MiB f32 per input tile (fits v5e's 16 MiB
                                 # default scoped VMEM with double-buffering)


def _round_up(x, m):
    return ((x + m - 1) // m) * m


def _choose_layout(n, lane=None, rows_per_tile=None):
    """Pick (lane, rows, block_rows, n_row_tiles) for n flat elements.

    lane is chosen so it divides n whenever n % 128 == 0, making the flat->2D
    reshape free (no jnp.pad copy).  Rows are NOT rounded up to the tile
    height; the last tile may be partial (masked inside the kernel).
    """
    if lane is None:
        if n % 128 == 0:
            lane = 128
            for cand in range(_MAX_LANE, 127, -128):
                if n % cand == 0:
                    lane = cand
                    break
        else:
            lane = min(_MAX_LANE, _round_up(max(n, 1), 128))
    rows = -(-n // lane)  # cdiv
    if rows_per_tile is None:
        rows_per_tile = max(8, (_TARGET_TILE_ELEMS // lane) // 8 * 8)
    if rows <= rows_per_tile:
        block_rows = rows           # single tile == full array -> always legal
        n_tiles = 1
    else:
        assert rows_per_tile % 8 == 0, "rows_per_tile must be a multiple of 8"
        block_rows = rows_per_tile
        n_tiles = -(-rows // block_rows)   # last tile may be partial
    return lane, rows, block_rows, n_tiles


def _flatten_to_2d(x, rows, lane):
    """Flatten to 1D and view as (rows, lane); pads only for awkward sizes."""
    flat = x.reshape(-1)
    total = rows * lane
    if total != flat.shape[0]:
        # Only when n % 128 != 0: pads < lane elements (still a copy, but this
        # path is only hit for small/ragged inputs).
        flat = jnp.pad(flat, (0, total - flat.shape[0]))
    return flat.reshape(rows, lane)


def _bce_elementwise(p_raw, t_raw):
    """loss = BCEWithLogits(sigmoid(p), t), exactly as the PyTorch reference.

    sigmoid via tanh (one EUP op instead of exp + reciprocal); since
    s = sigmoid(p) is in (0, 1), max(s, 0) == s and |s| == s, hence
      BCEWithLogits(s, t) = s - s*t + log1p(exp(-s)).
    """
    p = p_raw.astype(jnp.float32)
    t = t_raw.astype(jnp.float32)
    s = 0.5 * jnp.tanh(0.5 * p) + 0.5
    return s - s * t + jnp.log1p(jnp.exp(-s))


# --------------------------------------------------------------------------
# Reduction kernel ('mean' / 'sum'): no loss-map writeback.
# Grid = (n_chunks, tiles_per_chunk); leading axis "parallel" (2 TCs on v7x).
# Per-tile partials go into a full-tile VMEM accumulator (VALU only); the
# single XLU reduce + scale happen once per chunk.
# --------------------------------------------------------------------------
def _bce_sum_kernel(pred_ref, tgt_ref, out_ref, acc_ref, *,
                    tiles_per_chunk, first_pad_tile, rows_full, rem,
                    needs_mask, scale):
    c = pl.program_id(0)
    t = pl.program_id(1)
    block_rows, lane = pred_ref.shape

    @pl.when(t == 0)
    def _():
        acc_ref[...] = jnp.zeros_like(acc_ref)

    loss = _bce_elementwise(pred_ref[...], tgt_ref[...])

    if needs_mask:
        gtile = c * tiles_per_chunk + t

        @pl.when(gtile < first_pad_tile)          # fully-valid tiles: no mask math
        def _():
            acc_ref[...] += loss

        @pl.when(gtile >= first_pad_tile)         # only the padded / tail tiles
        def _():
            # Row-based comparison: no int32 flat-index overflow for huge n.
            row = jax.lax.broadcasted_iota(jnp.int32, (block_rows, lane), 0)
            grow = gtile * block_rows + row
            if rem == 0:
                valid = grow < rows_full
            else:
                col = jax.lax.broadcasted_iota(jnp.int32, (block_rows, lane), 1)
                valid = (grow < rows_full) | ((grow == rows_full) & (col < rem))
            acc_ref[...] += jnp.where(valid, loss, 0.0)
    else:
        acc_ref[...] += loss

    @pl.when(t == tiles_per_chunk - 1)
    def _():
        total = jnp.sum(acc_ref[...])             # single XLU reduce per chunk
        if scale != 1.0:
            total = total * jnp.float32(scale)
        # Lane-dense per-chunk partial output (value splatted over the tile).
        out_ref[...] = jnp.zeros(out_ref.shape, jnp.float32) + total


def _bce_reduce_pallas(pred, target, scale, *, lane=None, rows_per_tile=None):
    """Returns scale * sum(loss) as a 0-d float32 (scale = 1/n for 'mean')."""
    n = pred.size
    lane, rows, block_rows, n_tiles = _choose_layout(n, lane, rows_per_tile)
    p2 = _flatten_to_2d(pred, rows, lane)
    t2 = _flatten_to_2d(target, rows, lane)

    n_chunks = 2 if n_tiles >= 2 else 1          # leading "parallel" axis
    tiles_per_chunk = -(-n_tiles // n_chunks)
    covered = n_chunks * tiles_per_chunk * block_rows * lane
    needs_mask = covered != n
    first_pad_tile = n // (block_rows * lane)    # first tile containing padding
    rows_full = n // lane
    rem = n % lane
    last_tile = n_tiles - 1

    def in_map(c, t):
        # Clamp: when n_tiles is odd the last logical tile of the last chunk
        # has no data; it re-reads the last real tile and is fully masked.
        return (jnp.minimum(c * tiles_per_chunk + t, last_tile), 0)

    kernel = functools.partial(
        _bce_sum_kernel,
        tiles_per_chunk=tiles_per_chunk, first_pad_tile=first_pad_tile,
        rows_full=rows_full, rem=rem, needs_mask=needs_mask,
        scale=float(scale))

    out = pl.pallas_call(
        kernel,
        out_shape=jax.ShapeDtypeStruct((n_chunks, 8, 128), jnp.float32),
        grid=(n_chunks, tiles_per_chunk),
        in_specs=[
            pl.BlockSpec((block_rows, lane), in_map),
            pl.BlockSpec((block_rows, lane), in_map),
        ],
        out_specs=pl.BlockSpec((1, 8, 128), lambda c, t: (c, 0, 0)),
        scratch_shapes=[pltpu.VMEM((block_rows, lane), jnp.float32)],
        compiler_params=pltpu.CompilerParams(
            dimension_semantics=("parallel", "arbitrary")),
    )(p2, t2)
    # Trivial combine of the per-chunk partial sums (2 elements).
    return jnp.sum(out[:, 0, 0])


# --------------------------------------------------------------------------
# Map kernel ('none'): per-element loss, no reduction / scalar output.
# --------------------------------------------------------------------------
def _bce_map_kernel(pred_ref, tgt_ref, loss_ref):
    loss_ref[...] = _bce_elementwise(pred_ref[...], tgt_ref[...]).astype(
        loss_ref.dtype)


def _bce_map_pallas(pred, target, *, lane=None, rows_per_tile=None):
    """Returns the flattened per-element loss, shape (N*C,), in pred's dtype."""
    n = pred.size
    lane, rows, block_rows, n_tiles = _choose_layout(n, lane, rows_per_tile)
    p2 = _flatten_to_2d(pred, rows, lane)
    t2 = _flatten_to_2d(target, rows, lane)
    out_dtype = pred.dtype if jnp.issubdtype(pred.dtype, jnp.floating) else jnp.float32
    out = pl.pallas_call(
        _bce_map_kernel,
        out_shape=jax.ShapeDtypeStruct((rows, lane), out_dtype),
        grid=(n_tiles,),
        in_specs=[
            pl.BlockSpec((block_rows, lane), lambda i: (i, 0)),
            pl.BlockSpec((block_rows, lane), lambda i: (i, 0)),
        ],
        out_specs=pl.BlockSpec((block_rows, lane), lambda i: (i, 0)),
        compiler_params=pltpu.CompilerParams(
            dimension_semantics=("parallel",)),
    )(p2, t2)
    flat = out.reshape(-1)
    # No-op (no copy) when lane divides n, which is the common case.
    return flat if rows * lane == n else flat[:n]


class BCELoss:
    """JAX/Pallas port of the PyTorch BCELoss module (use_sigmoid=True)."""

    def __init__(self, use_sigmoid=True, reduction="mean"):
        assert use_sigmoid, "only use_sigmoid=True path is implemented (matches default)"
        self.use_sigmoid = use_sigmoid
        self.reduction = reduction

    def __call__(self, pred, target):
        pred = jnp.asarray(pred)
        target = jnp.asarray(target)
        if self.reduction == "sum":
            return _bce_reduce_pallas(pred, target, 1.0)
        elif self.reduction == "mean":
            return _bce_reduce_pallas(pred, target, 1.0 / pred.size)
        else:  # 'none' -> flattened per-element loss, shape (N*C,)
            return _bce_map_pallas(pred, target)


def _reference(pred, target, reduction="mean"):
    """Pure-JAX reference mirroring the PyTorch code (for correctness check)."""
    s = jax.nn.sigmoid(pred.astype(jnp.float32))
    t = target.astype(jnp.float32)
    loss = jnp.maximum(s, 0.0) - s * t + jnp.log1p(jnp.exp(-jnp.abs(s)))
    loss = loss.reshape(-1)
    if reduction == "sum":
        return loss.sum()
    elif reduction == "mean":
        return loss.mean()
    return loss


if __name__ == "__main__":
    key = jax.random.PRNGKey(0)
    k1, k2, k3, k4 = jax.random.split(key, 4)

    # Case 1: (N, C) = (64, 8) classification/quality logits. n % 128 == 0, so
    # no padding, no pad copies, no trailing slice copies.
    N, C = 64, 8
    pred = jax.random.normal(k1, (N, C), dtype=jnp.float32)
    target = jax.random.uniform(k2, (N, C), dtype=jnp.float32)  # quality in [0, 1]

    out_mean = jax.block_until_ready(BCELoss(reduction="mean")(pred, target))
    assert jnp.allclose(out_mean, _reference(pred, target, "mean"),
                        rtol=2e-5, atol=2e-5), out_mean

    out_sum = jax.block_until_ready(BCELoss(reduction="sum")(pred, target))
    assert jnp.allclose(out_sum, _reference(pred, target, "sum"),
                        rtol=2e-5, atol=1e-3), out_sum

    out_none = jax.block_until_ready(BCELoss(reduction="none")(pred, target))
    assert jnp.allclose(out_none, _reference(pred, target, "none"),
                        rtol=2e-5, atol=2e-5)

    # Case 2: ragged (37, 5) -> exercises lane padding + in-kernel masking.
    p2 = jax.random.normal(k3, (37, 5), dtype=jnp.float32)
    t2 = jax.random.uniform(k4, (37, 5), dtype=jnp.float32)
    out2 = jax.block_until_ready(BCELoss(reduction="mean")(p2, t2))
    assert jnp.allclose(out2, _reference(p2, t2, "mean"), rtol=2e-5, atol=2e-5)
    out2n = jax.block_until_ready(BCELoss(reduction="none")(p2, t2))
    assert jnp.allclose(out2n, _reference(p2, t2, "none"), rtol=2e-5, atol=2e-5)

    # Case 3: multi-tile, two-chunk grid with a masked partial last tile
    # (small test tile sizes to exercise the grid/chunking path).
    p3 = jax.random.normal(k1, (500, 7), dtype=jnp.float32)
    t3 = jax.random.uniform(k2, (500, 7), dtype=jnp.float32)
    out3 = jax.block_until_ready(
        _bce_reduce_pallas(p3, t3, 1.0 / p3.size, lane=128, rows_per_tile=8))
    assert jnp.allclose(out3, _reference(p3, t3, "mean"), rtol=2e-5, atol=2e-5)
    out3n = jax.block_until_ready(
        _bce_map_pallas(p3, t3, lane=128, rows_per_tile=8))
    assert jnp.allclose(out3n, _reference(p3, t3, "none"), rtol=2e-5, atol=2e-5)

    # Case 4: odd tile count -> exercises the clamped, fully-masked tail tile
    # of the second chunk.
    p4 = jax.random.normal(k3, (300, 7), dtype=jnp.float32)
    t4 = jax.random.uniform(k4, (300, 7), dtype=jnp.float32)
    out4 = jax.block_until_ready(
        _bce_reduce_pallas(p4, t4, 1.0, lane=128, rows_per_tile=8))
    assert jnp.allclose(out4, _reference(p4, t4, "sum"), rtol=2e-5, atol=1e-3)

    print("KERNEL_OK")
</pallas_src>

<mosaic_0001>
module attributes {stable_mosaic.version = 11 : i64} {
  func.func @_bce_sum_kernel(%arg0: i32, %arg1: i32, %arg2: memref<1x512xf32, #tpu.memory_space<vmem>>, %arg3: memref<1x512xf32, #tpu.memory_space<vmem>>, %arg4: memref<1x8x128xf32, #tpu.memory_space<vmem>>, %arg5: memref<1x512xf32, #tpu.memory_space<vmem>>) attributes {dimension_semantics = [#tpu.dimension_semantics<parallel>, #tpu.dimension_semantics<arbitrary>], iteration_bounds = array<i64: 1, 1>, scalar_prefetch = 0 : i64, scratch_operands = 1 : i64, tpu.core_type = #tpu.core_type<tc>, window_params = [{transform_indices = @transform_0, window_bounds = array<i64: 1, 512>}, {transform_indices = @transform_1, window_bounds = array<i64: 1, 512>}, {transform_indices = @transform_2, window_bounds = array<i64: 1, 8, 128>}]} {
    %c0_i32 = arith.constant 0 : i32
    %0 = arith.cmpi eq, %arg1, %c0_i32 : i32
    %1 = arith.extui %0 : i1 to i32
    %c0_i32_0 = arith.constant 0 : i32
    %2 = arith.cmpi ne, %1, %c0_i32_0 : i32
    scf.if %2 {
      %cst_13 = arith.constant 0.000000e+00 : f32
      %25 = vector.broadcast %cst_13 : f32 to vector<1x512xf32>
      %c0_14 = arith.constant 0 : index
      %c0_15 = arith.constant 0 : index
      %26 = vector.load %arg5[%c0_14, %c0_15] : memref<1x512xf32, #tpu.memory_space<vmem>>, vector<1x512xf32>
      tpu.vector_store %arg5[%c0_14, %c0_15], %25 {strides = array<i32>} : memref<1x512xf32, #tpu.memory_space<vmem>>, vector<1x512xf32>,
    } else {
    }
    %c0 = arith.constant 0 : index
    %c0_1 = arith.constant 0 : index
    %3 = vector.load %arg2[%c0, %c0_1] : memref<1x512xf32, #tpu.memory_space<vmem>>, vector<1x512xf32>
    %c0_2 = arith.constant 0 : index
    %c0_3 = arith.constant 0 : index
    %4 = vector.load %arg3[%c0_2, %c0_3] : memref<1x512xf32, #tpu.memory_space<vmem>>, vector<1x512xf32>
    %cst = arith.constant 5.000000e-01 : f32
    %5 = vector.broadcast %cst : f32 to vector<1x512xf32>
    %6 = arith.mulf %5, %3 : vector<1x512xf32>
    %7 = math.tanh %6 : vector<1x512xf32>
    %cst_4 = arith.constant 5.000000e-01 : f32
    %8 = vector.broadcast %cst_4 : f32 to vector<1x512xf32>
    %9 = arith.mulf %8, %7 : vector<1x512xf32>
    %cst_5 = arith.constant 5.000000e-01 : f32
    %10 = vector.broadcast %cst_5 : f32 to vector<1x512xf32>
    %11 = arith.addf %9, %10 : vector<1x512xf32>
    %12 = arith.mulf %11, %4 : vector<1x512xf32>
    %13 = arith.subf %11, %12 : vector<1x512xf32>
    %cst_6 = arith.constant 0.000000e+00 : f32
    %14 = vector.broadcast %cst_6 : f32 to vector<1x512xf32>
    %15 = arith.subf %14, %11 : vector<1x512xf32>
    %16 = math.exp %15 : vector<1x512xf32>
    %17 = math.log1p %16 : vector<1x512xf32>
    %18 = arith.addf %13, %17 : vector<1x512xf32>
    %c0_7 = arith.constant 0 : index
    %c0_8 = arith.constant 0 : index
    %19 = vector.load %arg5[%c0_7, %c0_8] : memref<1x512xf32, #tpu.memory_space<vmem>>, vector<1x512xf32>
    %20 = arith.addf %19, %18 : vector<1x512xf32>
    %c0_9 = arith.constant 0 : index
    %c0_10 = arith.constant 0 : index
    %21 = vector.load %arg5[%c0_9, %c0_10] : memref<1x512xf32, #tpu.memory_space<vmem>>, vector<1x512xf32>
    tpu.vector_store %arg5[%c0_9, %c0_10], %20 {strides = array<i32>} : memref<1x512xf32, #tpu.memory_space<vmem>>, vector<1x512xf32>,
    %c0_i32_11 = arith.constant 0 : i32
    %22 = arith.cmpi eq, %arg1, %c0_i32_11 : i32
    %23 = arith.extui %22 : i1 to i32
    %c0_i32_12 = arith.constant 0 : i32
    %24 = arith.cmpi ne, %23, %c0_i32_12 : i32
    scf.if %24 {
      %c0_13 = arith.constant 0 : index
      %c0_14 = arith.constant 0 : index
      %25 = vector.load %arg5[%c0_13, %c0_14] : memref<1x512xf32, #tpu.memory_space<vmem>>, vector<1x512xf32>
      %26 = vector.shape_cast %25 : vector<1x512xf32> to vector<1x1x512xf32>
      %cst_15 = arith.constant dense<0.000000e+00> : vector<1xf32>
      %27 = vector.multi_reduction <add>, %26, %cst_15 [1, 2] : vector<1x1x512xf32> to vector<1xf32>
      %28 = vector.shape_cast %27 : vector<1xf32> to vector<1x1x1xf32>
      %29 = vector.extract %28[0, 0, 0] : f32 from vector<1x1x1xf32>
      %cst_16 = arith.constant 0.001953125 : f32
      %30 = arith.mulf %29, %cst_16 : f32
      %cst_17 = arith.constant 0.000000e+00 : f32
      %31 = vector.broadcast %cst_17 : f32 to vector<1x8x128xf32>
      %32 = vector.broadcast %30 : f32 to vector<1x8x128xf32>
      %33 = arith.addf %31, %32 : vector<1x8x128xf32>
      %c0_18 = arith.constant 0 : index
      %c0_19 = arith.constant 0 : index
      %c0_20 = arith.constant 0 : index
      %34 = vector.load %arg4[%c0_18, %c0_19, %c0_20] : memref<1x8x128xf32, #tpu.memory_space<vmem>>, vector<1x8x128xf32>
      tpu.vector_store %arg4[%c0_18, %c0_19, %c0_20], %33 {strides = array<i32>} : memref<1x8x128xf32, #tpu.memory_space<vmem>>, vector<1x8x128xf32>,
    } else {
    }
    return
  }
  func.func @transform_0(%arg0: i32, %arg1: i32) -> (i32, i32) {
    %c1_i32 = arith.constant 1 : i32
    %0 = arith.muli %arg0, %c1_i32 : i32
    %1 = arith.addi %0, %arg1 : i32
    %c0_i32 = arith.constant 0 : i32
    %2 = arith.minsi %1, %c0_i32 : i32
    %c0_i32_0 = arith.constant 0 : i32
    %c0_i32_1 = arith.constant 0 : i32
    return %2, %c0_i32_0 : i32, i32
  }
  func.func @transform_1(%arg0: i32, %arg1: i32) -> (i32, i32) {
    %c1_i32 = arith.constant 1 : i32
    %0 = arith.muli %arg0, %c1_i32 : i32
    %1 = arith.addi %0, %arg1 : i32
    %c0_i32 = arith.constant 0 : i32
    %2 = arith.minsi %1, %c0_i32 : i32
    %c0_i32_0 = arith.constant 0 : i32
    %c0_i32_1 = arith.constant 0 : i32
    return %2, %c0_i32_0 : i32, i32
  }
  func.func @transform_2(%arg0: i32, %arg1: i32) -> (i32, i32, i32) {
    %c0_i32 = arith.constant 0 : i32
    %c0_i32_0 = arith.constant 0 : i32
    %c0_i32_1 = arith.constant 0 : i32
    return %arg0, %c0_i32, %c0_i32_0 : i32, i32, i32
  }
}

</mosaic_0001>

<bundles_post_ra>
// kernel: tpu_custom_call.1
= control target key start
LH: loop header
LB: loop body
LE: loop exit
PB: predicated region body
PF: predicated region fallthrough
CT: control target
= control target key end

     0   :  { %7 = vsyncpa [#allocation4], 0  ;;  %s304_s0 = inlined_call_operand.hbm [shape: f32[1,512], index: 0, kind: input, shape index: {}]   ;;  %s305_s1 = inlined_call_operand.hbm [shape: f32[1,512], index: 1, kind: input, shape index: {}]   ;;  %s306_s2 = inlined_call_operand.hbm [shape: f32[1,8,128], index: 2, kind: output, shape index: {}]  }
   0x1   :  { %8 = vsyncpa [#allocation7], 0 }
   0x2   :  { %9 = vsyncpa [#allocation5], 0  ;;  %s241_s9 = smov [#allocation3]   ;;  %s242_s11 = smov [#allocation6]  }
   0x3   :  { %s22_s10 = sshll.u32 %s241_s9, 4  ;;  %s38_s12 = sshll.u32 %s242_s11, 4  ;;  %s23_s10 = int_to_ptr.vmem [resolvable:$true] %s22_s10  ;;  %s39_s12 = int_to_ptr.vmem [resolvable:$true] %s38_s12 }
   0x4   :  { %s169_s15 = scalar_lea.hbm %s304_s0, 64 }
   0x5   :  { %p170_p0 = scmp.ne.s32.totalorder %s304_s0, %s169_s15  ;;  %p173_p1 = scmp.lt.u32.totalorder %s169_s15, %s304_s0 }
   0x7   :  { %p175_p2 = pnand %p173_p1, %p170_p0 }
   0x9   :  { %178 = shalt.err (!%p175_p2)
}
   0xa   :  { %s179_s20 = scalar_lea.vmem %s23_s10, 64  ;;  %p184_p4 = scmp.lt.s32.totalorder %s23_s10, %s23_s10 }
   0xb   :  { %p180_p3 = scmp.ne.s32.totalorder %s23_s10, %s179_s20  ;;  %p185_p5 = scmp.lt.s32.totalorder %s179_s20, %s179_s20 }
   0xd   :  { %p186_p6 = por %p185_p5, %p184_p4 }
   0xf   :  { %p187_p7 = pnand %p186_p6, %p180_p3 }
  0x11   :  { %190 = shalt.err (!%p187_p7)
}
  0x12   :  { %25 = dma.hbm_to_vmem [thread:$0]  %s304_s0, 64, %s23_s10, [#allocation4]  }
  0x13   :  { %s191_s25 = scalar_lea.hbm %s305_s1, 64 }
  0x14   :  { %p192_p8 = scmp.ne.s32.totalorder %s305_s1, %s191_s25  ;;  %p195_p9 = scmp.lt.u32.totalorder %s191_s25, %s305_s1 }
  0x16   :  { %p197_p10 = pnand %p195_p9, %p192_p8 }
  0x18   :  { %200 = shalt.err (!%p197_p10)
}
  0x19   :  { %s201_s30 = scalar_lea.vmem %s39_s12, 64  ;;  %p206_p12 = scmp.lt.s32.totalorder %s39_s12, %s39_s12 }
  0x1a   :  { %p202_p11 = scmp.ne.s32.totalorder %s39_s12, %s201_s30  ;;  %p207_p13 = scmp.lt.s32.totalorder %s201_s30, %s201_s30 }
  0x1c   :  { %p208_p0 = por %p207_p13, %p206_p12 }
  0x1e   :  { %p209_p1 = pnand %p208_p0, %p202_p11 }
  0x20   :  { %212 = shalt.err (!%p209_p1)
}
  0x21   :  { %41 = dma.hbm_to_vmem [thread:$0]  %s305_s1, 64, %s39_s12, [#allocation7]  }
  0x22   :  { %235 = dma.done.wait [#allocation4], 64  }
  0x23   :  { %236 = vsyncadd [#allocation4], 4294967232 }
  0x24   :  { %237 = dma.done.wait [#allocation7], 64  }
  0x25   :  { %238 = vsyncadd [#allocation7], 4294967232  ;;  %v58_v0 = vlaneseq  ;;  %v243_v2 = vmov 0.0   ;;  %v63_v3 = vld [vmem:[#allocation3] sm:$0xf]  ;;  %vm116_vm2 = vcmask 1040384  }
  0x26   :  { %v65_v4 = vmul.f32 0.5, %v63_v3  ;;  %v64_v13 = vld [vmem:[#allocation6] sm:$0xf]  ;;  %s244_s1 = smov [#allocation8]  }
  0x27   :  { %vm284_vm0 = vcmp.lt.s32.totalorder %v58_v0, 512  ;;  %v97_v25 = vshrl.u32 %v58_v0, 7  ;;  %s143_s4 = sshll.u32 %s244_s1, 4  ;;  %s144_s4 = int_to_ptr.vmem [resolvable:$true] %s143_s4 }
  0x28   :  { %62 = vst.msk [vmem:[#allocation2] sm:$0xf] %vm284_vm0, %v243_v2  ;;  %163 = vtanh.f32 %v65_v4  ;;  %s213_s7 = scalar_lea.vmem %s144_s4, 128  ;;  %p218_p3 = scmp.lt.s32.totalorder %s144_s4, %s144_s4 }
  0x29   :  { %v98_v26 = vsub.s32 0, %v97_v25  ;;  %v102_v27 = vsub.s32 1, %v97_v25  ;;  %v106_v28 = vsub.s32 2, %v97_v25  ;;  %v110_v29 = vsub.s32 3, %v97_v25  ;;  %p214_p2 = scmp.ne.s32.totalorder %s144_s4, %s213_s7  ;;  %p219_p4 = scmp.lt.s32.totalorder %s213_s7, %s213_s7 }
  0x2b   :  { %p220_p5 = por %p219_p4, %p218_p3 }
  0x2d   :  { %p221_p6 = pnand %p220_p5, %p214_p2 }
  0x2f   :  { %v84_v22 = vld [vmem:[#allocation2] sm:$0xf] }
  0x32   :  { %v164_v5 = vpop.eup %163 }
  0x33   :  { %v67_v6 = vmul.f32 0.5, %v164_v5 }
  0x35   :  { %v68_v7 = vadd.f32 0.5, %v67_v6 }
  0x37   :  { %v71_v8 = vsub.f32 0.0, %v68_v7  ;;  %v69_v15 = vmul.f32 %v68_v7, %v64_v13 }
  0x39   :  { %v72_v9 = vmul.f32 1.442695, %v71_v8  ;;  %v70_v19 = vsub.f32 %v68_v7, %v69_v15 }
  0x3b   :  { %165 = vpow2.f32 %v72_v9 }
  0x45   :  { %v166_v10 = vpop.eup %165 }
  0x46   :  { %v74_v11 = vadd.f32 1.0, %v166_v10  ;;  %v77_v12 = vmul.f32 -0.5, %v166_v10  ;;  %v80_v16 = vand.u32 2147483647, %v166_v10 }
  0x48   :  { %167 = vlog2.f32 %v74_v11  ;;  %v78_v14 = vadd.f32 1.0, %v77_v12  ;;  %vm81_vm1 = vcmp.lt.f32.partialorder %v80_v16, 0.0004427343 }
  0x4a   :  { %v79_v17 = vmul.f32 %v166_v10, %v78_v14 }
  0x52   :  { %v168_v18 = vpop.eup %167 }
  0x53   :  { %v76_v20 = vmul.f32 0.6931472, %v168_v18 }
  0x55   :  { %v82_v21 = vsel %vm81_vm1, %v79_v17, %v76_v20 }
  0x56   :  { %v83_v23 = vadd.f32 %v82_v21, %v70_v19 }
  0x58   :  { %v85_v24 = vadd.f32 %v84_v22, %v83_v23 }
  0x5a   :  { %90 = vst.msk [vmem:[#allocation2] sm:$0xf] %vm284_vm0, %v85_v24 }
  0x61   :  { %v94_v30 = vld [vmem:[#allocation2] sm:$0xf] }
  0x62   :  { %v99_v31 = vrot.slane %v94_v30, %v98_v26  ;;  %v103_v32 = vrot.slane %v94_v30, %v102_v27  ;;  %v107_v33 = vrot.slane %v94_v30, %v106_v28  ;;  %v111_v34 = vrot.slane %v94_v30, %v110_v29 }
  0x64   :  { %v117_v35 = vsel %vm116_vm2, %v99_v31, 0.0  ;;  %v118_v36 = vsel %vm116_vm2, %v103_v32, 0.0  ;;  %v120_v37 = vsel %vm116_vm2, %v107_v33, 0.0  ;;  %v122_v39 = vsel %vm116_vm2, %v111_v34, 0.0 }
  0x65   :  { %v119_v38 = vadd.f32 %v118_v36, %v117_v35 }
  0x67   :  { %v121_v40 = vadd.f32 %v120_v37, %v119_v38 }
  0x69   :  { %v123_v41 = vadd.f32 %v122_v39, %v121_v40 }
  0x6b   :  { %124 = vadd.xlane.f32.xlu0 %v123_v41 }
  0xf8   :  { %v125_v42 = vpop.xlane.xlu0 %124 }
  0xf9   :  { %v126_v43 = vrot.slane %v125_v42, 4 }
  0xfb   :  { %v127_v44 = vadd.f32 %v126_v43, %v125_v42 }
  0xfd   :  { %v128_v45 = vrot.slane %v127_v44, 2 }
  0xff   :  { %v129_v46 = vadd.f32 %v128_v45, %v127_v44 }
 0x101   :  { %v130_v47 = vrot.slane %v129_v46, 1 }
 0x103   :  { %v131_v48 = vadd.f32 %v130_v47, %v129_v46 }
 0x105   :  { %157 = vpush %v131_v48 }
 0x136   :  { %s158_s5 = spop %157 }
 0x137   :  { %s133_s6 = smul.f32 0.001953125, %s158_s5 }
 0x139   :  { %v134_v49 = vstv %s133_s6 }
 0x13a   :  { %136 = vst [vmem:[#allocation8] sm:$0xff] %v134_v49 }
 0x13b   :  { %224 = shalt.err (!%p221_p6)
}
 0x13c   :  { %s225_s10 = scalar_lea.hbm %s306_s2, 128 }
 0x13d   :  { %p226_p7 = scmp.ne.s32.totalorder %s306_s2, %s225_s10  ;;  %p229_p8 = scmp.lt.u32.totalorder %s225_s10, %s306_s2 }
 0x13f   :  { %p231_p9 = pnand %p229_p8, %p226_p7 }
 0x141   :  { %234 = shalt.err (!%p231_p9)
}
 0x142   :  { %146 = dma.vmem_to_hbm [thread:$0]  %s144_s4, 128, %s306_s2, [#allocation5]  }
 0x143   :  { %239 = dma.done.wait [#allocation5], 128  }
 0x144   :  { %240 = vsyncadd [#allocation5], 4294967168 }
 0x145   :  { %150 = vsyncpa [#allocation4], 1 }
 0x146   :  { %151 = vsyncpa [#allocation7], 1 }
 0x147   :  { %152 = vsyncpa [#allocation5], 1 }

</bundles_post_ra>
